<compile_context>
chip_gen: v6e
topology: v6e:2x2x1
jax: 0.10.0
libtpu: 0.0.40
codegen_flags: <defaults>
</compile_context>

<pallas_src>
import functools

import jax
import jax.numpy as jnp
from jax.experimental import pallas as pl
from jax.experimental.pallas import tpu as pltpu

ALPHA = 1.0
GAMMA = 2.0          # gamma == 2 is applied as an explicit square below
EPSILON = 1e-12
LANES = 128
SUBLANES = 8


def _round_up(x, m):
    return ((x + m - 1) // m) * m


def _focal_partial_kernel(logits_ref, target_ref, out_ref, *, tile_rows, total):
    """One grid step: focal loss over a (tile_rows, 128) tile -> (8, 128) partial sum."""
    i = pl.program_id(0)

    x = logits_ref[...].astype(jnp.float32)
    t = target_ref[...].astype(jnp.float32)

    # probs = sigmoid(logits)
    probs = 1.0 / (1.0 + jnp.exp(-x))

    # Reference (soft-label capable) formulation from the PyTorch module.
    log_pt = t * jnp.log(probs + EPSILON) + (1.0 - t) * jnp.log((1.0 - probs) + EPSILON)
    pt = jnp.exp(log_pt)
    one_minus_pt = 1.0 - pt
    # gamma == 2 -> explicit square (VPU mul) instead of pow.
    focal = (-ALPHA) * (one_minus_pt * one_minus_pt) * log_pt

    # Explicitly zero out padded elements (flat index >= total).  This makes
    # correctness independent of whatever values sit in the padded region.
    # TODO(synk): flat index is int32 — fine for any realistic [batch, classes]
    # logits; would need int64 math for > 2^31 elements.
    row = jax.lax.broadcasted_iota(jnp.int32, (tile_rows, LANES), 0)
    lane = jax.lax.broadcasted_iota(jnp.int32, (tile_rows, LANES), 1)
    flat = (i * tile_rows + row) * LANES + lane
    focal = jnp.where(flat < total, focal, 0.0)

    # Fold sublane-groups together with VPU adds only; the expensive
    # cross-lane/sublane reduce happens once, outside the kernel.
    out_ref[...] = focal.reshape(tile_rows // SUBLANES, SUBLANES, LANES).sum(axis=0)


@functools.partial(jax.jit, static_argnames=("tile_rows",))
def focal_loss(logits, target, *, tile_rows=2048):
    """Mean focal loss over all elements of [batch_size, num_classes] logits/target."""
    assert logits.shape == target.shape
    total = logits.size

    # Lane-dense layout: rows of 128 lanes.
    rows_needed = pl.cdiv(total, LANES)
    tile_rows = max(SUBLANES, min(tile_rows, _round_up(rows_needed, SUBLANES)))
    tile_rows = _round_up(tile_rows, SUBLANES)

    num_tiles = pl.cdiv(rows_needed, tile_rows)
    padded_rows = num_tiles * tile_rows
    pad = padded_rows * LANES - total

    # Benign padding (logit=0, target=0); the in-kernel mask zeroes it anyway.
    lf = jnp.pad(logits.reshape(-1).astype(jnp.float32), (0, pad)).reshape(padded_rows, LANES)
    tf = jnp.pad(target.reshape(-1).astype(jnp.float32), (0, pad)).reshape(padded_rows, LANES)

    kernel = functools.partial(_focal_partial_kernel, tile_rows=tile_rows, total=total)

    partials = pl.pallas_call(
        kernel,
        out_shape=jax.ShapeDtypeStruct((num_tiles * SUBLANES, LANES), jnp.float32),
        grid=(num_tiles,),
        in_specs=[
            pl.BlockSpec((tile_rows, LANES), lambda i: (i, 0)),
            pl.BlockSpec((tile_rows, LANES), lambda i: (i, 0)),
        ],
        out_specs=pl.BlockSpec((SUBLANES, LANES), lambda i: (i, 0)),
        compiler_params=pltpu.CompilerParams(
            # each step writes a distinct output block -> fully parallel;
            # lets v7x shard tiles across its two TensorCores.
            dimension_semantics=("parallel",),
        ),
    )(lf, tf)

    # Tiny final reduce + mean in plain JAX.
    return jnp.sum(partials) / jnp.float32(total)


def focal_loss_ref(logits, target):
    """Direct JAX transcription of the PyTorch FocalLoss.forward."""
    probs = jax.nn.sigmoid(logits.astype(jnp.float32))
    one_subtract_probs = 1.0 - probs
    probs_new = probs + EPSILON
    one_subtract_probs_new = one_subtract_probs + EPSILON
    log_pt = target * jnp.log(probs_new) + (1.0 - target) * jnp.log(one_subtract_probs_new)
    pt = jnp.exp(log_pt)
    focal = -1.0 * (ALPHA * (1.0 - pt) ** GAMMA) * log_pt
    return jnp.mean(focal)


if __name__ == "__main__":
    key = jax.random.PRNGKey(0)
    k1, k2, k3, k4, k5 = jax.random.split(key, 5)

    # Small shape matching the module's [batch_size, num_classes] contract.
    B, N = 16, 32
    logits = jax.random.normal(k1, (B, N), dtype=jnp.float32) * 2.0
    target = (jax.random.uniform(k2, (B, N)) > 0.5).astype(jnp.float32)

    out = jax.block_until_ready(focal_loss(logits, target))
    ref = focal_loss_ref(logits, target)
    assert jnp.allclose(out, ref, rtol=1e-5, atol=1e-5), (out, ref)

    # Second case: forces padding + a multi-tile grid (tiny tiles just to
    # exercise the pipelined multi-step path at small scale).
    B2, N2 = 32, 160
    logits2 = jax.random.normal(k3, (B2, N2), dtype=jnp.float32) * 3.0
    target2 = (jax.random.uniform(k4, (B2, N2)) > 0.5).astype(jnp.float32)
    out2 = jax.block_until_ready(focal_loss(logits2, target2, tile_rows=16))
    ref2 = focal_loss_ref(logits2, target2)
    assert jnp.allclose(out2, ref2, rtol=1e-5, atol=1e-5), (out2, ref2)

    # Soft-label case (targets in [0, 1]) — same formulation as the module.
    target3 = jax.random.uniform(k5, (B, N), dtype=jnp.float32)
    out3 = jax.block_until_ready(focal_loss(logits, target3))
    ref3 = focal_loss_ref(logits, target3)
    assert jnp.allclose(out3, ref3, rtol=1e-5, atol=1e-5), (out3, ref3)

    print("KERNEL_OK")
</pallas_src>

<mosaic_0001>
module attributes {stable_mosaic.version = 11 : i64} {
  func.func @_focal_partial_kernel(%arg0: i32, %arg1: memref<8x128xf32, #tpu.memory_space<vmem>>, %arg2: memref<8x128xf32, #tpu.memory_space<vmem>>, %arg3: memref<8x128xf32, #tpu.memory_space<vmem>>) attributes {dimension_semantics = [#tpu.dimension_semantics<parallel>], iteration_bounds = array<i64: 1>, scalar_prefetch = 0 : i64, scratch_operands = 0 : i64, tpu.core_type = #tpu.core_type<tc>, window_params = [{transform_indices = @transform_0, window_bounds = array<i64: 8, 128>}, {transform_indices = @transform_1, window_bounds = array<i64: 8, 128>}, {transform_indices = @transform_2, window_bounds = array<i64: 8, 128>}]} {
    %c0 = arith.constant 0 : index
    %c0_0 = arith.constant 0 : index
    %0 = vector.load %arg1[%c0, %c0_0] : memref<8x128xf32, #tpu.memory_space<vmem>>, vector<8x128xf32>
    %c0_1 = arith.constant 0 : index
    %c0_2 = arith.constant 0 : index
    %1 = vector.load %arg2[%c0_1, %c0_2] : memref<8x128xf32, #tpu.memory_space<vmem>>, vector<8x128xf32>
    %cst = arith.constant 0.000000e+00 : f32
    %2 = vector.broadcast %cst : f32 to vector<8x128xf32>
    %3 = arith.subf %2, %0 : vector<8x128xf32>
    %4 = math.exp %3 : vector<8x128xf32>
    %cst_3 = arith.constant 1.000000e+00 : f32
    %5 = vector.broadcast %cst_3 : f32 to vector<8x128xf32>
    %6 = arith.addf %5, %4 : vector<8x128xf32>
    %cst_4 = arith.constant 1.000000e+00 : f32
    %7 = vector.broadcast %cst_4 : f32 to vector<8x128xf32>
    %8 = arith.divf %7, %6 : vector<8x128xf32>
    %cst_5 = arith.constant 9.99999996E-13 : f32
    %9 = vector.broadcast %cst_5 : f32 to vector<8x128xf32>
    %10 = arith.addf %8, %9 : vector<8x128xf32>
    %11 = math.log %10 : vector<8x128xf32>
    %12 = arith.mulf %1, %11 : vector<8x128xf32>
    %cst_6 = arith.constant 1.000000e+00 : f32
    %13 = vector.broadcast %cst_6 : f32 to vector<8x128xf32>
    %14 = arith.subf %13, %1 : vector<8x128xf32>
    %cst_7 = arith.constant 1.000000e+00 : f32
    %15 = vector.broadcast %cst_7 : f32 to vector<8x128xf32>
    %16 = arith.subf %15, %8 : vector<8x128xf32>
    %cst_8 = arith.constant 9.99999996E-13 : f32
    %17 = vector.broadcast %cst_8 : f32 to vector<8x128xf32>
    %18 = arith.addf %16, %17 : vector<8x128xf32>
    %19 = math.log %18 : vector<8x128xf32>
    %20 = arith.mulf %14, %19 : vector<8x128xf32>
    %21 = arith.addf %12, %20 : vector<8x128xf32>
    %22 = math.exp %21 : vector<8x128xf32>
    %cst_9 = arith.constant 1.000000e+00 : f32
    %23 = vector.broadcast %cst_9 : f32 to vector<8x128xf32>
    %24 = arith.subf %23, %22 : vector<8x128xf32>
    %25 = arith.mulf %24, %24 : vector<8x128xf32>
    %cst_10 = arith.constant -1.000000e+00 : f32
    %26 = vector.broadcast %cst_10 : f32 to vector<8x128xf32>
    %27 = arith.mulf %26, %25 : vector<8x128xf32>
    %28 = arith.mulf %27, %21 : vector<8x128xf32>
    %29 = tpu.iota {dimensions = array<i32: 0>} : vector<8x128xi32>
    %30 = tpu.iota {dimensions = array<i32: 1>} : vector<8x128xi32>
    %c8_i32 = arith.constant 8 : i32
    %31 = arith.muli %arg0, %c8_i32 : i32
    %32 = vector.broadcast %31 : i32 to vector<8x128xi32>
    %33 = arith.addi %32, %29 : vector<8x128xi32>
    %c128_i32 = arith.constant 128 : i32
    %34 = vector.broadcast %c128_i32 : i32 to vector<8x128xi32>
    %35 = arith.muli %33, %34 : vector<8x128xi32>
    %36 = arith.addi %35, %30 : vector<8x128xi32>
    %c512_i32 = arith.constant 512 : i32
    %37 = vector.broadcast %c512_i32 : i32 to vector<8x128xi32>
    %38 = arith.cmpi slt, %36, %37 : vector<8x128xi32>
    %cst_11 = arith.constant 0.000000e+00 : f32
    %39 = vector.broadcast %cst_11 : f32 to vector<8x128xf32>
    %40 = arith.select %38, %28, %39 : vector<8x128xi1>, vector<8x128xf32>
    %41 = vector.shape_cast %40 : vector<8x128xf32> to vector<1x8x128xf32>
    %cst_12 = arith.constant dense<0.000000e+00> : vector<8x128xf32>
    %42 = vector.multi_reduction <add>, %41, %cst_12 [0] : vector<1x8x128xf32> to vector<8x128xf32>
    %c0_13 = arith.constant 0 : index
    %c0_14 = arith.constant 0 : index
    %43 = vector.load %arg3[%c0_13, %c0_14] : memref<8x128xf32, #tpu.memory_space<vmem>>, vector<8x128xf32>
    tpu.vector_store %arg3[%c0_13, %c0_14], %42 {strides = array<i32>} : memref<8x128xf32, #tpu.memory_space<vmem>>, vector<8x128xf32>,
    return
  }
  func.func @transform_0(%arg0: i32) -> (i32, i32) {
    %c0_i32 = arith.constant 0 : i32
    %c0_i32_0 = arith.constant 0 : i32
    return %arg0, %c0_i32 : i32, i32
  }
  func.func @transform_1(%arg0: i32) -> (i32, i32) {
    %c0_i32 = arith.constant 0 : i32
    %c0_i32_0 = arith.constant 0 : i32
    return %arg0, %c0_i32 : i32, i32
  }
  func.func @transform_2(%arg0: i32) -> (i32, i32) {
    %c0_i32 = arith.constant 0 : i32
    %c0_i32_0 = arith.constant 0 : i32
    return %arg0, %c0_i32 : i32, i32
  }
}

</mosaic_0001>

<bundles_post_ra>
// kernel: focal_loss.1
= control target key start
LH: loop header
LB: loop body
LE: loop exit
PB: predicated region body
PF: predicated region fallthrough
CT: control target
= control target key end

     0   :  { %v36_v19 = vlaneseq  ;;  %s87_s0 = inlined_call_operand.vmem [shape: f32[8,128], index: 0, kind: input, shape index: {}]   ;;  %s88_s1 = inlined_call_operand.vmem [shape: f32[8,128], index: 1, kind: input, shape index: {}]   ;;  %s89_s2 = inlined_call_operand.vmem [shape: f32[8,128], index: 2, kind: output, shape index: {}]  }
   0x1   :  { %v11_v0 = vld [vmem:[%s87_s0] sm:$0xff] }
   0x2   :  { %v13_v1 = vsub.f32 0.0, %v11_v0  ;;  %v12_v9 = vld [vmem:[%s88_s1] sm:$0xff]  ;;  %v37_v20 = vshrl.u32 %v36_v19, 7  ;;  %v39_v21 = vand.u32 127, %v36_v19 }
   0x3   :  { %v23_v12 = vsub.f32 1.0, %v12_v9 }
   0x4   :  { %v14_v2 = vmul.f32 1.442695, %v13_v1  ;;  %v43_v22 = vmul.u32 128, %v37_v20 }
   0x6   :  { %53 = vpow2.f32 %v14_v2  ;;  %v44_v25 = vadd.s32 %v43_v22, %v39_v21 }
   0x8   :  { %vm45_vm0 = vcmp.lt.s32.totalorder %v44_v25, 512 }
  0x13   :  { %v54_v3 = vpop.eup %53 }
  0x14   :  { %v16_v4 = vadd.f32 1.0, %v54_v3 }
  0x16   :  { %55 = vrcp.f32 %v16_v4 }
  0x23   :  { %v56_v5 = vpop.eup %55 }
  0x24   :  { %v19_v6 = vadd.f32 1e-12, %v56_v5  ;;  %v24_v7 = vsub.f32 1.0, %v56_v5 }
  0x26   :  { %57 = vlog2.f32 %v19_v6  ;;  %v25_v8 = vadd.f32 1e-12, %v24_v7 }
  0x28   :  { %59 = vlog2.f32 %v25_v8 }
  0x33   :  { %v58_v10 = vpop.eup %57 }
  0x34   :  { %v21_v11 = vmul.f32 0.6931472, %v58_v10 }
  0x35   :  { %v60_v13 = vpop.eup %59 }
  0x36   :  { %v22_v14 = vmul.f32 %v21_v11, %v12_v9  ;;  %v27_v15 = vmul.f32 0.6931472, %v60_v13 }
  0x38   :  { %v28_v16 = vmul.f32 %v27_v15, %v23_v12 }
  0x3a   :  { %v29_v17 = vadd.f32 %v28_v16, %v22_v14 }
  0x3c   :  { %v30_v18 = vmul.f32 1.442695, %v29_v17 }
  0x3e   :  { %61 = vpow2.f32 %v30_v18 }
  0x4b   :  { %v62_v23 = vpop.eup %61 }
  0x4c   :  { %v32_v24 = vsub.f32 1.0, %v62_v23 }
  0x4e   :  { %v33_v26 = vmul.f32 %v32_v24, %v32_v24 }
  0x50   :  { %v34_v27 = vmul.f32 -1.0, %v33_v26 }
  0x52   :  { %v35_v28 = vmul.f32 %v34_v27, %v29_v17 }
  0x54   :  { %v46_v29 = vsel %vm45_vm0, %v35_v28, 0.0 }
  0x55   :  { %48 = vst [vmem:[%s89_s2] sm:$0xff] %v46_v29 }

</bundles_post_ra>
